<compile_context>
chip_gen: v6e
topology: v6e:2x2x1
jax: 0.10.0
libtpu: 0.0.40
codegen_flags: <defaults>
</compile_context>

<pallas_src>
import jax
import jax.numpy as jnp
import numpy as np
from jax import lax
from jax.experimental import pallas as pl
from jax.experimental.pallas import tpu as pltpu

EPS = 1e-5
NPH = 4          # number of sub-pixel phases for stride 2 (2x2)
KWIN = 3         # 3x3 input window covers all 4 phases for k=4, s=2, p=1


def _round_up(a, b):
    return (a + b - 1) // b * b


def _gemm_stats_kernel(w_ref, p_ref, sum_ref, sumsq_ref):
    """Pass 1: GEMM + per-tile BN partial sums.

    w_ref:     (NPH*Cout, KK*Cin)   bf16  (phase-packed sub-kernels)
    p_ref:     (KK*Cin,  TILE_M)    bf16  (3x3-window patches, pixels on lanes)
    sum_ref:   (1, NPH*Cout, 1)     f32   per-tile per-column sum
    sumsq_ref: (1, NPH*Cout, 1)     f32   per-tile per-column sum of squares
    """
    acc = jnp.dot(w_ref[...], p_ref[...], preferred_element_type=jnp.float32)
    sum_ref[...] = jnp.sum(acc, axis=1, keepdims=True)[None]
    sumsq_ref[...] = jnp.sum(acc * acc, axis=1, keepdims=True)[None]


def _gemm_bn_relu_kernel(w_ref, scale_ref, shift_ref, p_ref, o_ref):
    """Pass 2: GEMM + fused per-channel affine (BatchNorm) + ReLU, lane-dense store.

    scale_ref / shift_ref: (NPH*Cout, 1) f32, precomputed in the wrapper.
    o_ref: (NPH*Cout, TILE_M) f32.
    """
    acc = jnp.dot(w_ref[...], p_ref[...], preferred_element_type=jnp.float32)
    y = acc * scale_ref[...] + shift_ref[...]
    o_ref[...] = jnp.maximum(y, 0.0).astype(o_ref.dtype)


def g_block_forward(x_nchw, weight, gamma, beta, *, tile_m=None):
    """Forward of G_block.

    x_nchw: (N, Cin, H, W) f32; weight: (Cin, Cout, 4, 4) (PyTorch ConvTranspose2d layout);
    gamma/beta: (Cout,).  Returns (N, Cout, 2H, 2W) f32.
    """
    N, Cin, H, W = x_nchw.shape
    Cin_w, Cout, K, K2 = weight.shape
    assert Cin_w == Cin and K == 4 and K2 == 4, "phase decomposition derived for k=4,s=2,p=1"
    stride, padding = 2, 1
    Hout, Wout = 2 * H, 2 * W
    Mq = N * H * W                     # output "quads" (one per input pixel)
    KKC = KWIN * KWIN * Cin            # 3*3*Cin patch depth

    # ---- tiling over M (pixels-on-lanes axis) ----
    if tile_m is None:
        tile_m = min(2048, _round_up(Mq, 128))
    tile_m = _round_up(int(tile_m), 128)
    num_tiles = -(-Mq // tile_m)
    Mp = num_tiles * tile_m

    # ---- glue (plain JAX): channel-major padded input -> (KKC, Mq) patch matrix ----
    # rows ordered (dy, dx, ci); columns ordered (n, qy, qx)
    xT = jnp.transpose(x_nchw, (1, 0, 2, 3))                 # (Cin, N, H, W)
    xT = jnp.pad(xT, ((0, 0), (0, 0), (1, 1), (1, 1)))       # 1-pixel halo
    xT = xT.astype(jnp.bfloat16)
    patches = jnp.concatenate(
        [xT[:, :, dy:dy + H, dx:dx + W].reshape(Cin, Mq)
         for dy in range(KWIN) for dx in range(KWIN)],
        axis=0)                                              # (KKC, Mq)
    if Mp != Mq:
        patches = jnp.pad(patches, ((0, 0), (0, Mp - Mq)))   # zero cols: no effect on GEMM/stats

    # ---- glue: pack the 4 per-phase 2x2 sub-kernels into one (NPH*Cout, KKC) matrix ----
    # output row r = (ry*2 + rx)*Cout + co ; column c = (dy*3 + dx)*Cin + ci
    # valid taps: kh = ry + (K-1) - stride*dy in [0, K), same for kw.
    wm = jnp.zeros((NPH * Cout, KKC), jnp.float32)
    for ry in range(2):
        for rx in range(2):
            for dy in range(KWIN):
                kh = ry + (K - 1) - stride * dy
                if not 0 <= kh < K:
                    continue
                for dx in range(KWIN):
                    kw = rx + (K - 1) - stride * dx
                    if not 0 <= kw < K:
                        continue
                    r0 = (ry * 2 + rx) * Cout
                    c0 = (dy * KWIN + dx) * Cin
                    wm = wm.at[r0:r0 + Cout, c0:c0 + Cin].set(weight[:, :, kh, kw].T)
    wm = wm.astype(jnp.bfloat16)

    grid = (num_tiles,)
    w_spec = pl.BlockSpec((NPH * Cout, KKC), lambda i: (0, 0))
    p_spec = pl.BlockSpec((KKC, tile_m), lambda i: (0, i))
    cparams = pltpu.CompilerParams(
        dimension_semantics=("parallel",),     # M axis -> both TCs on v7x; free on v5e/v6e
        vmem_limit_bytes=32 * 1024 * 1024,
    )

    # ---- pass 1: GEMM + per-tile BN partial statistics ----
    stat_spec = pl.BlockSpec((1, NPH * Cout, 1), lambda i: (i, 0, 0))
    stat_shape = jax.ShapeDtypeStruct((num_tiles, NPH * Cout, 1), jnp.float32)
    psum, psumsq = pl.pallas_call(
        _gemm_stats_kernel,
        out_shape=(stat_shape, stat_shape),
        grid=grid,
        in_specs=[w_spec, p_spec],
        out_specs=(stat_spec, stat_spec),
        compiler_params=cparams,
    )(wm, patches)

    # ---- tiny host-side (XLA) reduction: per-channel mean/var -> affine scale/shift ----
    count = jnp.float32(NPH * Mq)                              # = N * Hout * Wout per channel
    sums = psum[:, :, 0].sum(axis=0).reshape(NPH, Cout).sum(axis=0)      # (Cout,)
    sumsqs = psumsq[:, :, 0].sum(axis=0).reshape(NPH, Cout).sum(axis=0)  # (Cout,)
    mean = sums / count
    var = jnp.maximum(sumsqs / count - mean * mean, 0.0)       # guard against cancellation
    inv = lax.rsqrt(var + EPS)
    scale_c = gamma.astype(jnp.float32) * inv
    shift_c = beta.astype(jnp.float32) - mean * scale_c
    scale4 = jnp.tile(scale_c, NPH).reshape(NPH * Cout, 1)     # per (phase, channel) row
    shift4 = jnp.tile(shift_c, NPH).reshape(NPH * Cout, 1)

    # ---- pass 2: GEMM (recomputed) + fused BN affine + ReLU ----
    vec_spec = pl.BlockSpec((NPH * Cout, 1), lambda i: (0, 0))
    out_mat = pl.pallas_call(
        _gemm_bn_relu_kernel,
        out_shape=jax.ShapeDtypeStruct((NPH * Cout, Mp), jnp.float32),
        grid=grid,
        in_specs=[w_spec, vec_spec, vec_spec, p_spec],
        out_specs=pl.BlockSpec((NPH * Cout, tile_m), lambda i: (0, i)),
        compiler_params=cparams,
    )(wm, scale4, shift4, patches)

    # ---- glue: drop M padding, interleave phases, emit NCHW in one reshuffle ----
    out_mat = out_mat[:, :Mq]
    y = (out_mat.reshape(2, 2, Cout, N, H, W)        # (ry, rx, co, n, qy, qx)
         .transpose(3, 2, 4, 0, 5, 1)                # (n, co, qy, ry, qx, rx)
         .reshape(N, Cout, Hout, Wout))
    return y


def reference_forward(x_nchw, weight, gamma, beta, *, stride=2, padding=1):
    """Pure-JAX reference (lhs-dilated conv == transposed conv).

    Uses the same precision contract as the kernel (bf16-quantized GEMM operands,
    f32 accumulation) so the comparison tolerance can stay tight.
    """
    x = x_nchw.astype(jnp.bfloat16).astype(jnp.float32)
    w = weight.astype(jnp.bfloat16).astype(jnp.float32)
    N, Cin, H, W = x.shape
    _, Cout, K, _ = w.shape
    xh = jnp.transpose(x, (0, 2, 3, 1))
    wf = jnp.transpose(w[:, :, ::-1, ::-1], (2, 3, 0, 1))     # HWIO, flipped
    pad = K - 1 - padding
    y = lax.conv_general_dilated(
        xh, wf, window_strides=(1, 1),
        padding=[(pad, pad), (pad, pad)],
        lhs_dilation=(stride, stride),
        dimension_numbers=("NHWC", "HWIO", "NHWC"),
        precision=lax.Precision.HIGHEST)
    mean = jnp.mean(y, axis=(0, 1, 2))
    var = jnp.mean((y - mean) ** 2, axis=(0, 1, 2))
    y = (y - mean) * lax.rsqrt(var + EPS) * gamma + beta
    y = jnp.maximum(y, 0.0)
    return jnp.transpose(y, (0, 3, 1, 2))


if __name__ == "__main__":
    # Small shapes consistent with the module: in_channels=3 (default), out_channels=8.
    N, Cin, H, W = 2, 3, 16, 16
    Cout, K = 8, 4

    key = jax.random.PRNGKey(0)
    kx, kw = jax.random.split(key)
    x = jax.random.normal(kx, (N, Cin, H, W), dtype=jnp.float32)
    weight = 0.1 * jax.random.normal(kw, (Cin, Cout, K, K), dtype=jnp.float32)  # ConvTranspose2d layout
    gamma = jnp.ones((Cout,), jnp.float32)   # BatchNorm2d default affine init
    beta = jnp.zeros((Cout,), jnp.float32)

    # tile_m=256 -> 2 grid steps at this size, exercising the tiled/partial-stats path.
    out = jax.block_until_ready(g_block_forward(x, weight, gamma, beta, tile_m=256))
    ref = jax.block_until_ready(reference_forward(x, weight, gamma, beta))

    assert out.shape == (N, Cout, 2 * H, 2 * W), out.shape
    np.testing.assert_allclose(np.asarray(out), np.asarray(ref), rtol=5e-4, atol=5e-4)

    print("KERNEL_OK")
</pallas_src>

<mosaic_0001>
module attributes {stable_mosaic.version = 11 : i64} {
  func.func @_gemm_stats_kernel(%arg0: i32, %arg1: memref<32x27xbf16, #tpu.memory_space<vmem>>, %arg2: memref<27x256xbf16, #tpu.memory_space<vmem>>, %arg3: memref<1x32x1xf32, #tpu.memory_space<vmem>>, %arg4: memref<1x32x1xf32, #tpu.memory_space<vmem>>) attributes {dimension_semantics = [#tpu.dimension_semantics<parallel>], iteration_bounds = array<i64: 2>, scalar_prefetch = 0 : i64, scratch_operands = 0 : i64, tpu.core_type = #tpu.core_type<tc>, window_params = [{pipeline_mode = #tpu.pipeline_mode<synchronous>, transform_indices = @transform_0, window_bounds = array<i64: 32, 27>}, {transform_indices = @transform_1, window_bounds = array<i64: 27, 256>}, {transform_indices = @transform_2, window_bounds = array<i64: 1, 32, 1>}, {transform_indices = @transform_3, window_bounds = array<i64: 1, 32, 1>}]} {
    %c0 = arith.constant 0 : index
    %c0_0 = arith.constant 0 : index
    %0 = vector.load %arg1[%c0, %c0_0] : memref<32x27xbf16, #tpu.memory_space<vmem>>, vector<32x27xbf16>
    %c0_1 = arith.constant 0 : index
    %c0_2 = arith.constant 0 : index
    %1 = vector.load %arg2[%c0_1, %c0_2] : memref<27x256xbf16, #tpu.memory_space<vmem>>, vector<27x256xbf16>
    %cst = arith.constant dense<0.000000e+00> : vector<32x256xf32>
    %2 = tpu.matmul %0, %1, %cst {dimension_numbers = #tpu.dot_dimension_numbers<[1], [0], [0], [1], [0, 0, 1, 1], [], []>} : vector<32x27xbf16>, vector<27x256xbf16>, vector<32x256xf32> -> vector<32x256xf32>
    %cst_3 = arith.constant dense<0.000000e+00> : vector<32xf32>
    %3 = vector.multi_reduction <add>, %2, %cst_3 [1] : vector<32x256xf32> to vector<32xf32>
    %4 = vector.shape_cast %3 : vector<32xf32> to vector<32x1xf32>
    %5 = vector.shape_cast %4 : vector<32x1xf32> to vector<1x32x1xf32>
    %c0_4 = arith.constant 0 : index
    %c0_5 = arith.constant 0 : index
    %c0_6 = arith.constant 0 : index
    %6 = vector.load %arg3[%c0_4, %c0_5, %c0_6] : memref<1x32x1xf32, #tpu.memory_space<vmem>>, vector<1x32x1xf32>
    tpu.vector_store %arg3[%c0_4, %c0_5, %c0_6], %5 {strides = array<i32>} : memref<1x32x1xf32, #tpu.memory_space<vmem>>, vector<1x32x1xf32>,
    %7 = arith.mulf %2, %2 : vector<32x256xf32>
    %cst_7 = arith.constant dense<0.000000e+00> : vector<32xf32>
    %8 = vector.multi_reduction <add>, %7, %cst_7 [1] : vector<32x256xf32> to vector<32xf32>
    %9 = vector.shape_cast %8 : vector<32xf32> to vector<32x1xf32>
    %10 = vector.shape_cast %9 : vector<32x1xf32> to vector<1x32x1xf32>
    %c0_8 = arith.constant 0 : index
    %c0_9 = arith.constant 0 : index
    %c0_10 = arith.constant 0 : index
    %11 = vector.load %arg4[%c0_8, %c0_9, %c0_10] : memref<1x32x1xf32, #tpu.memory_space<vmem>>, vector<1x32x1xf32>
    tpu.vector_store %arg4[%c0_8, %c0_9, %c0_10], %10 {strides = array<i32>} : memref<1x32x1xf32, #tpu.memory_space<vmem>>, vector<1x32x1xf32>,
    return
  }
  func.func @transform_0(%arg0: i32) -> (i32, i32) {
    %c0_i32 = arith.constant 0 : i32
    %c0_i32_0 = arith.constant 0 : i32
    %c0_i32_1 = arith.constant 0 : i32
    return %c0_i32, %c0_i32_0 : i32, i32
  }
  func.func @transform_1(%arg0: i32) -> (i32, i32) {
    %c0_i32 = arith.constant 0 : i32
    %c0_i32_0 = arith.constant 0 : i32
    return %c0_i32, %arg0 : i32, i32
  }
  func.func @transform_2(%arg0: i32) -> (i32, i32, i32) {
    %c0_i32 = arith.constant 0 : i32
    %c0_i32_0 = arith.constant 0 : i32
    %c0_i32_1 = arith.constant 0 : i32
    return %arg0, %c0_i32, %c0_i32_0 : i32, i32, i32
  }
  func.func @transform_3(%arg0: i32) -> (i32, i32, i32) {
    %c0_i32 = arith.constant 0 : i32
    %c0_i32_0 = arith.constant 0 : i32
    %c0_i32_1 = arith.constant 0 : i32
    return %arg0, %c0_i32, %c0_i32_0 : i32, i32, i32
  }
}

</mosaic_0001>

<bundles_post_ra>
// kernel: tpu_custom_call.1
= control target key start
LH: loop header
LB: loop body
LE: loop exit
PB: predicated region body
PF: predicated region fallthrough
CT: control target
= control target key end

     0   :  { %9 = vsyncpa [#allocation3], 0  ;;  %s842_s0 = inlined_call_operand.hbm [shape: bf16[32,27], index: 0, kind: input, shape index: {}]   ;;  %s843_s1 = inlined_call_operand.hbm [shape: bf16[27,512], index: 1, kind: input, shape index: {}]   ;;  %s844_s2 = inlined_call_operand.vmem [shape: f32[2,32,1], index: 2, kind: output, shape index: {0}]   ;;  %s845_s3 = inlined_call_operand.vmem [shape: f32[2,32,1], index: 3, kind: output, shape index: {1}]  }
   0x1   :  { %10 = vsyncpa [#allocation5], 0 }
   0x2   :  { %12 = vsyncpa [#allocation5 + $0x1], 0  ;;  %s699_s12 = smov 0   ;;  %s701_s13 = smov 0  }
   0x3   :  { %s703_s14 = smov 0   ;;  %s705_s15 = smov 0  }
   0x4 LB: > { %s718_s16 = sadd.s32 4294967295, %s668_s15   ;;  %s721_s17 = sadd.s32 1, %s668_s15   ;;  %s668_s15 = sphi %s705_s15, %s861_s15   ;;  %s664_s14 = sphi %s703_s14, %s860_s14   ;;  %s660_s13 = sphi %s701_s13, %s859_s13   ;;  %s656_s12 = sphi %s699_s12, %s858_s12  }
   0x5   : > { %s43_s18 = ssub.s32 %s668_s15, %s721_s17  ;;  %s46_s19 = sadd.s32 1, %s664_s14 }
   0x6   : > { %p44_p0 = scmp.eq.s32.totalorder %s43_s18, 0  ;;  %p53_p1 = scmp.ne.s32.totalorder %s664_s14, %s660_s13 }
   0x7   : > { %p54_p2 = scmp.eq.s32.totalorder %s668_s15, 0  ;;  %p59_p3 = scmp.ne.s32.totalorder %s660_s13, %s656_s12 }
   0x8   : > { %s731_s20 = scalar_select %p44_p0, %s664_s14, %s46_s19  }
   0x9   : > { %p733_p4 = por %p54_p2, %p53_p1  ;;  %p846_p5 = scmp.eq.s32.totalorder %s718_s16, 0 }
   0xa   : > { %p481_p6 = scmp.ge.s32.totalorder %s668_s15, 1  ;;  %p122_p7 = scmp.lt.s32.totalorder %s668_s15, 3 }
   0xb   : > { %p742_p8 = por %p846_p5, %p59_p3  ;;  %s670_s24 = smov [#allocation2]  }
   0xc   : > { %p746_p9 = pnand %p481_p6, %p122_p7  ;;  %s134_s25 = sshll.u32 %s670_s24, 4  ;;  %s135_s25 = int_to_ptr.vmem [resolvable:$true] %s134_s25 }
   0xd   : > { %s850_s22 = scalar_select %p742_p8, 1, 0 }
   0xe   : > { %s851_s23 = scalar_select %p746_p9, 1, 0 }
   0xf   : > { %p517_p10 = pneg %p746_p9  ;;  %p526_p12 = scmp.lt.s32.totalorder %s668_s15, 2 }
  0x10   : > { %s148_s27 = sand.u32 1, %s664_s14   ;;  %s504_s28 = sshll.u32 %s668_s15, 7 }
  0x11   : > { %p754_p11 = pnand %p517_p10, %p846_p5  ;;  %p763_p13 = pnand %p526_p12, %p733_p4 }
  0x12   : > { %s587_s30 = scalar_lea.vmem %s135_s25, 256  ;;  %p595_p6 = scmp.lt.s32.totalorder %s135_s25, %s135_s25 }
  0x13   : > { %p578_p0 = pneg %p754_p11  ;;  %p588_p1 = scmp.ne.s32.totalorder %s135_s25, %s587_s30 }
  0x14   : > { %p596_p7 = scmp.lt.s32.totalorder %s587_s30, %s587_s30 }
  0x15   : > { %p590_p2 = pnand %p588_p1, %p578_p0 }
  0x16   : > { %p597_p10 = por %p596_p7, %p595_p6 }
  0x17   : > { %p591_p3 = pneg %p590_p2 }
  0x19   : > { %p598_p5 = pnand %p597_p10, %p591_p3 }
  0x1b   : > { %601 = shalt.err (!%p598_p5)
}
  0x1c   : > { %s671_s4 = smov 64   ;;  %s672_s5 = smov 4  }
  0x1d   : > { %520 = dma.hbm_to_vmem [thread:$0]  (!%p754_p11), %s842_s0, 256, %s135_s25, [#allocation3], %s671_s4, %s671_s4, %s672_s5  }
  0x1e   : > { %s484_s8 = sshll.u32 %s148_s27, 5  ;;  %s777_s11 = scalar_lea.hbm %s843_s1, %s504_s28 }
  0x1f   : > { %s152_s12 = scalar_lea.vmem [#allocation4], %s484_s8  ;;  %s781_s18 = scalar_lea.sflag [#allocation5], %s148_s27 }
  0x20   : > { %s159_s15 = sshll.u32 %s152_s12, 4  ;;  %s602_s19 = scalar_lea.hbm %s777_s11, 512  ;;  %s779_s15 = int_to_ptr.vmem [resolvable:$true] %s159_s15 }
  0x21   : > { %p603_p4 = scmp.ne.s32.totalorder %s777_s11, %s602_s19  ;;  %p604_p5 = pneg %p763_p13 }
  0x22   : > { %s607_s25 = scalar_lea.hbm %s843_s1, 1024  ;;  %p608_p0 = scmp.lt.s32.totalorder %s777_s11, %s843_s1 }
  0x23   : > { %p605_p11 = pnand %p604_p5, %p603_p4  ;;  %p609_p1 = scmp.lt.s32.totalorder %s607_s25, %s602_s19 }
  0x25   : > { %p606_p12 = pneg %p605_p11  ;;  %p610_p2 = por %p609_p1, %p608_p0 }
  0x27   : > { %p611_p3 = pnand %p610_p2, %p606_p12 }
  0x29   : > { %614 = shalt.err (!%p611_p3)
}
  0x2a   : > { %s615_s27 = scalar_lea.vmem %s779_s15, 512  ;;  %s673_s30 = smov [#allocation4]  }
  0x2b   : > { %p616_p6 = scmp.ne.s32.totalorder %s779_s15, %s615_s27  ;;  %s620_s4 = sshll.u32 %s673_s30, 4  ;;  %s621_s4 = int_to_ptr.vmem [resolvable:$false] %s620_s4 }
  0x2c   : > { %s622_s5 = scalar_lea.vmem %s621_s4, 1024  ;;  %p623_p4 = scmp.lt.s32.totalorder %s779_s15, %s621_s4 }
  0x2d   : > { %p618_p7 = pnand %p616_p6, %p604_p5  ;;  %p624_p11 = scmp.lt.s32.totalorder %s622_s5, %s615_s27 }
  0x2f   : > { %p619_p10 = pneg %p618_p7  ;;  %p625_p8 = por %p624_p11, %p623_p4 }
  0x31   : > { %p626_p9 = pnand %p625_p8, %p619_p10 }
  0x33   : > { %629 = shalt.err (!%p626_p9)
}
  0x34   : > { %s674_s6 = smov 256   ;;  %s675_s7 = smov 128  }
  0x35   : > { %s676_s8 = smov 8   ;;  %p854_p5 = scmp.ne.s32.totalorder %s851_s23, 0 }
  0x36   : > { %524 = dma.hbm_to_vmem [thread:$0]  (!%p763_p13), %s777_s11, 512, %s779_s15, %s781_s18, %s674_s6, %s675_s7, %s676_s8  }
  0x37   : > { %171 = sbr.rel (%p854_p5) target bundleno = 426 (0x1aa), region = 28  ;;  %p855_p12 = scmp.eq.s32.totalorder (!%p854_p5), %s718_s16, 0 }
  0x3c   : > { %647 = dma.done.wait (%p855_p12), [#allocation3], 256   ;;  %p856_p0 = pmov %p855_p12 }
  0x3d   : > { %s177_s9 = sand.u32 1, %s660_s13   ;;  %p857_p8 = scmp.ne.s32.totalorder %s850_s22, 0 }
  0x3e   : > { %649 = vsyncadd (%p856_p0), [#allocation3], 4294967040  ;;  %s489_s10 = sshll.u32 %s177_s9, 5  ;;  %s178_s12 = scalar_lea.sflag [#allocation5], %s177_s9 }
  0x3f   : > { %s181_s19 = scalar_lea.vmem [#allocation4], %s489_s10 }
  0x40   : > { %651 = dma.done.wait (%p857_p8), %s178_s12, 512  }
  0x41   : > { %653 = vsyncadd (%p857_p8), %s178_s12, 4294966784  ;;  %vm264_vm0 = vcmask 1044480   ;;  %v677_v0 = vmov 0   ;;  %vm265_vm1 = vcmask 1045504   ;;  %v678_v1 = vmov 65535   ;;  %v574_v10 = vld [vmem:[#allocation2] sm:$0xff]  }
  0x42   : > { %306 = vmatprep.mubr.bf16.mxu0 %v677_v0  ;;  %316 = vmatprep.mubr.bf16.mxu1 %v677_v0  ;;  %v266_v2 = vsel %vm264_vm0, 4294967295, %v678_v1  ;;  %v568_v4 = vld [vmem:[%s181_s19 + $0x14] ss:$8 sps:$4 sm:$0x3f]   ;;  %v571_v7 = vld [vmem:[%s181_s19 + $0x4] ss:$8 sps:$4 sm:$0xff]  }
  0x43   : > { %v267_v3 = vsel %vm265_vm1, %v266_v2, 0  ;;  %v570_v5 = vld [vmem:[%s181_s19 + $0x10] ss:$8 sps:$4 sm:$0x3f]   ;;  %v573_v9 = vld [vmem:[%s181_s19] ss:$8 sps:$4 sm:$0xff]  }
  0x44   : > { %v272_v6 = vand.u32 %v568_v4, %v267_v3  ;;  %v269_v8 = vand.u32 %v570_v5, %v267_v3  ;;  %v575_v11 = vld [vmem:[#allocation2 + $0x8] sm:$0xff]   ;;  %vm257_vm2 = vcmask 220160   ;;  %p210_p9 = scmp.lt.s32.totalorder %s718_s16, 1  ;;  %vm339_vm3 = vcmask 7168  }
  0x46   : > { %286 = vmatprep.subr.bf16.mxu0 %v272_v6  ;;  %507 = vmatprep.subr.bf16.mxu1 %v272_v6  ;;  %s863_s16 = smov (!%p210_p9, %s718_s16), 1 }
  0x47   : > { %287 = vmatpush1.bf16.msra.mxu0 %v269_v8  ;;  %509 = vmatpush1.bf16.msra.mxu1 %v269_v8  ;;  %s505_s22 = sshll.u32 %s863_s16, 5 }
  0x48   : > { %288 = vmatprep.subr.bf16.mxu0 %v571_v7  ;;  %508 = vmatprep.subr.bf16.mxu1 %v571_v7  ;;  %s214_s11 = scalar_lea.vmem %s844_s2, %s505_s22  ;;  %s219_s21 = scalar_lea.vmem %s845_s3, %s505_s22 }
  0x4b   : > { %289 = vmatpush1.bf16.msra.mxu0 %v573_v9  ;;  %510 = vmatpush1.bf16.msra.mxu1 %v573_v9 }
  0x4e   : > { %500 = vmatmul.mubr.msk.bf16.vlgmr.msra.gmra.mxu0 %vm257_vm2, %v574_v10  ;;  %501 = vmatmul.mubr.msk.bf16.vlgmr.msra.gmra.mxu1 %vm257_vm2, %v575_v11 }
 0x10e   : > { %v308_v12 = vpop.f32.mrf.mxu0  ;;  %v318_v13 = vpop.f32.mrf.mxu1 }
 0x10f   : > { %v344_v21 = vmul.f32 %v308_v12, %v308_v12  ;;  %v348_v32 = vmul.f32 %v318_v13, %v318_v13 }
 0x110   : > { %v310_v14 = vpop.f32.mrf.mxu0  ;;  %v320_v15 = vpop.f32.mrf.mxu1 }
 0x111   : > { %v345_v16 = vmul.f32 %v310_v14, %v310_v14  ;;  %v333_v17 = vadd.f32 %v320_v15, %v318_v13  ;;  %v327_v18 = vadd.f32 %v310_v14, %v308_v12  ;;  %v349_v28 = vmul.f32 %v320_v15, %v320_v15 }
 0x112   : > { %v312_v19 = vpop.f32.mrf.mxu0  ;;  %v322_v20 = vpop.f32.mrf.mxu1 }
 0x113   : > { %334 = vadd.xlane.f32.xlu1 %v333_v17  ;;  %328 = vadd.xlane.f32.xlu0 %v327_v18  ;;  %v352_v26 = vadd.f32 %v345_v16, %v344_v21  ;;  %v346_v27 = vmul.f32 %v312_v19, %v312_v19  ;;  %v350_v33 = vmul.f32 %v322_v20, %v322_v20 }
 0x114   : > { %v314_v22 = vpop.f32.mrf.mxu0  ;;  %v324_v23 = vpop.f32.mrf.mxu1  ;;  %v358_v35 = vadd.f32 %v349_v28, %v348_v32 }
 0x115   : > { %v347_v24 = vmul.f32 %v314_v22, %v314_v22  ;;  %v336_v25 = vadd.f32 %v324_v23, %v322_v20  ;;  %v330_v29 = vadd.f32 %v314_v22, %v312_v19  ;;  %v351_v30 = vmul.f32 %v324_v23, %v324_v23 }
 0x117   : > { %337 = vadd.xlane.f32.xlu1 %v336_v25  ;;  %353 = vadd.xlane.f32.xlu0 %v352_v26  ;;  %v355_v31 = vadd.f32 %v347_v24, %v346_v27  ;;  %v361_v34 = vadd.f32 %v351_v30, %v350_v33 }
 0x11b   : > { %356 = vadd.xlane.f32.xlu1 %v355_v31  ;;  %331 = vadd.xlane.f32.xlu0 %v330_v29 }
 0x11f   : > { %362 = vadd.xlane.f32.xlu1 %v361_v34  ;;  %359 = vadd.xlane.f32.xlu0 %v358_v35 }
 0x19c   : > { %v335_v36 = vpop.xlane.xlu1 %334  ;;  %v329_v37 = vpop.xlane.xlu0 %328 }
 0x19d   : > { %342 = vst.msk [vmem:[%s214_s11 + $0x10] sm:$0xff] %vm339_vm3, %v335_v36  ;;  %340 = vst.msk [vmem:[%s214_s11] sm:$0xff] %vm339_vm3, %v329_v37 }
 0x1a0   : > { %v338_v38 = vpop.xlane.xlu1 %337  ;;  %v354_v39 = vpop.xlane.xlu0 %353 }
 0x1a1   : > { %343 = vst.msk [vmem:[%s214_s11 + $0x18] sm:$0xff] %vm339_vm3, %v338_v38  ;;  %364 = vst.msk [vmem:[%s219_s21] sm:$0xff] %vm339_vm3, %v354_v39 }
 0x1a4   : > { %v357_v40 = vpop.xlane.xlu1 %356  ;;  %v332_v41 = vpop.xlane.xlu0 %331 }
 0x1a5   : > { %365 = vst.msk [vmem:[%s219_s21 + $0x8] sm:$0xff] %vm339_vm3, %v357_v40  ;;  %341 = vst.msk [vmem:[%s214_s11 + $0x8] sm:$0xff] %vm339_vm3, %v332_v41 }
 0x1a8   : > { %v363_v42 = vpop.xlane.xlu1 %362  ;;  %v360_v43 = vpop.xlane.xlu0 %359 }
 0x1a9   : > { %367 = vst.msk [vmem:[%s219_s21 + $0x18] sm:$0xff] %vm339_vm3, %v363_v42  ;;  %366 = vst.msk [vmem:[%s219_s21 + $0x10] sm:$0xff] %vm339_vm3, %v360_v43 }
 0x1aa PF: > { %p15_p13 = scmp.ge.s32.totalorder %s721_s17, 4   ;;  %s858_s12 = smov %s660_s13 }
 0x1ab   : > { %s859_s13 = smov %s664_s14  ;;  %s860_s14 = smov %s731_s20 }
 0x1ac   : > { %s861_s15 = smov %s721_s17  ;;  %17 = sbr.rel (!%p15_p13) target bundleno = 4 (0x4), region = 85 }
 0x1b1   :  { %405 = vsyncpa [#allocation3], 1 }
 0x1b2   :  { %407 = vsyncpa [#allocation3 + $0x1], 1 }
 0x1b3   :  { %408 = vsyncpa [#allocation5], 1 }
 0x1b4   :  { %410 = vsyncpa [#allocation5 + $0x1], 1 }

</bundles_post_ra>
